<compile_context>
chip_gen: v7x
topology: tpu7x:2x2x1
jax: 0.10.0
libtpu: 0.0.40
codegen_flags: <defaults>
</compile_context>

<pallas_src>
import functools
import numpy as np
import jax
import jax.numpy as jnp
from jax.experimental import pallas as pl
from jax.experimental.pallas import tpu as pltpu


# ----------------------------- Pallas kernel -----------------------------

def fused_forward_kernel(xpm_ref, ws_ref, bs_ref, bc_ref, att_ref, pw_ref,
                         wc_hbm_ref, logits_ref, scores_ref, wc_vmem, sem):
    """Fused: APPM window scores + stem(+folded GAP) + classifier.

    The bf16 classifier weight is DMA'd HBM->VMEM at entry so the copy overlaps
    the two matmuls that do not depend on it; .wait() sits right before the
    classifier dot.
    """
    wc_copy = pltpu.make_async_copy(wc_hbm_ref, wc_vmem, sem)
    wc_copy.start()

    # APPM: all 73 stride-1 avg-pool windows as one lane-dense (B,64)@(64,128)
    # matmul against a constant pooling-weight matrix (padded to 128 lanes).
    scores_ref[...] = jnp.dot(att_ref[...], pw_ref[...],
                              preferred_element_type=jnp.float32)

    # Stem with the global average pool folded through it (both are linear):
    # embedding = (B, 8) @ (8, C) + bias   (K padded 3 -> 8 with zeros).
    emb = jnp.dot(xpm_ref[...], ws_ref[...],
                  preferred_element_type=jnp.float32) + bs_ref[...]

    # Classifier: bf16 MXU operands, f32 accumulate, lane-dense 128 output.
    wc_copy.wait()
    logits_ref[...] = (jnp.dot(emb.astype(jnp.bfloat16), wc_vmem[...],
                               preferred_element_type=jnp.float32)
                       + bc_ref[...])


def fused_forward_call(xp_mean_pad, w_stem_pad, b_stem, b_cls_pad,
                       att_flat, pool_w, w_cls_bf16):
    B, Kp = xp_mean_pad.shape
    C = w_stem_pad.shape[1]
    Np = w_cls_bf16.shape[1]      # padded logits width (128)
    Kw = att_flat.shape[1]        # 64 attention cells
    Nw = pool_w.shape[1]          # padded window count (128)
    return pl.pallas_call(
        fused_forward_kernel,
        out_shape=(jax.ShapeDtypeStruct((B, Np), jnp.float32),    # padded logits
                   jax.ShapeDtypeStruct((B, Nw), jnp.float32)),   # padded scores
        grid=(1,),
        in_specs=[pl.BlockSpec((B, Kp), lambda i: (0, 0)),
                  pl.BlockSpec((Kp, C), lambda i: (0, 0)),
                  pl.BlockSpec((1, C), lambda i: (0, 0)),
                  pl.BlockSpec((1, Np), lambda i: (0, 0)),
                  pl.BlockSpec((B, Kw), lambda i: (0, 0)),
                  pl.BlockSpec((Kw, Nw), lambda i: (0, 0)),
                  pl.BlockSpec(memory_space=pl.ANY)],             # w_cls stays in HBM
        out_specs=(pl.BlockSpec((B, Np), lambda i: (0, 0)),
                   pl.BlockSpec((B, Nw), lambda i: (0, 0))),
        scratch_shapes=[pltpu.VMEM((C, Np), jnp.bfloat16),
                        pltpu.SemaphoreType.DMA(())],
        compiler_params=pltpu.CompilerParams(
            dimension_semantics=("arbitrary",)),
    )(xp_mean_pad, w_stem_pad, b_stem, b_cls_pad, att_flat, pool_w, w_cls_bf16)


# ---------------- single jitted device program (glue + kernel) ----------------

@functools.partial(jax.jit, static_argnames=("num_classes", "n_windows"))
def _device_forward(x, att, w_stem_pad, b_stem, w_cls_bf16, b_cls_pad, pool_w,
                    *, num_classes, n_windows):
    B, Cin, _, _ = x.shape
    # Synthetic backbone glue: the 8x8 average stem followed by the global
    # average pool is just the per-channel spatial mean (everything is linear).
    xp_mean = jnp.mean(x, axis=(2, 3))                            # (B, Cin)
    xp_mean_pad = jnp.pad(
        xp_mean, ((0, 0), (0, w_stem_pad.shape[0] - Cin)))        # (B, 8)
    att_flat = att.reshape(B, -1)                                 # (B, 64); channel dim is 1
    logits_pad, scores_pad = fused_forward_call(
        xp_mean_pad, w_stem_pad, b_stem, b_cls_pad, att_flat, pool_w, w_cls_bf16)
    return logits_pad[:, :num_classes], scores_pad[:, :n_windows]


# ------------------------ host-side NMS (numpy, as in reference) ------------------------

def nms(scores_np, proposalN, iou_threshs, coordinates, IND=None):
    if not (type(scores_np).__module__ == 'numpy' and len(scores_np.shape) == 2
            and (scores_np.shape[1] == 1)):
        raise TypeError('score_np is not right')
    windows_num = scores_np.shape[0]
    indices_coordinates = np.concatenate((scores_np, coordinates), 1)
    if IND is not None:
        indices = IND
    else:
        indices = np.argsort(indices_coordinates[:, 0])
    indices_coordinates = np.concatenate(
        (indices_coordinates, np.arange(0, windows_num).reshape(windows_num, 1)), 1)[indices]
    indices_results = []
    res = indices_coordinates
    while res.any():
        indice_coordinates = res[-1]
        indices_results.append(indice_coordinates[5])
        if len(indices_results) == proposalN:
            return np.array(indices_results).reshape(1, proposalN).astype(np.int64)
        res = res[:-1]
        start_max = np.maximum(res[:, 1:3], indice_coordinates[1:3])
        end_min = np.minimum(res[:, 3:5], indice_coordinates[3:5])
        lengths = end_min - start_max + 1
        intersec_map = lengths[:, 0] * lengths[:, 1]
        intersec_map[np.logical_or(lengths[:, 0] < 0, lengths[:, 1] < 0)] = 0
        iou_map_cur = intersec_map / (
            (res[:, 3] - res[:, 1] + 1) * (res[:, 4] - res[:, 2] + 1)
            + (indice_coordinates[3] - indice_coordinates[1] + 1)
            * (indice_coordinates[4] - indice_coordinates[2] + 1) - intersec_map)
        res = res[iou_map_cur <= iou_threshs]
    while len(indices_results) != proposalN:
        indices_results.append(indice_coordinates[5])
    return np.array(indices_results).reshape(1, -1).astype(np.int64)


# ------------------------ proposal-window configuration ------------------------

RATIOS = [[4, 4], [3, 5], [5, 3]]     # AvgPool2d kernel sizes
STRIDE = 1
ATT_SIZE = 8                           # attention map is 8x8
IMG_STRIDE = 4                         # att-grid -> 32x32 image coordinates
N_LIST = [2, 2, 2]
PROPOSAL_N = sum(N_LIST)               # 6
IOU_THRESHS = [0.25, 0.25, 0.25]


def compute_window_coordinates(att_size, ratios, stride, img_stride):
    coords, window_nums = [], []
    for (kh, kw) in ratios:
        oh = (att_size - kh) // stride + 1
        ow = (att_size - kw) // stride + 1
        window_nums.append(oh * ow)
        for i in range(oh):
            for j in range(ow):
                x0 = i * stride * img_stride
                y0 = j * stride * img_stride
                x1 = (i * stride + kh) * img_stride - 1
                y1 = (j * stride + kw) * img_stride - 1
                coords.append([x0, y0, x1, y1])
    return np.array(coords, dtype=np.float64), window_nums


coordinates_cat, WINDOW_NUMS = compute_window_coordinates(ATT_SIZE, RATIOS, STRIDE, IMG_STRIDE)
WINDOW_NUMS_SUM = [0] + WINDOW_NUMS    # one NMS group per ratio


def build_pool_weight_matrix(att_size, ratios):
    """Constant (att_size^2, n_windows_padded) matrix: column w averages window w."""
    cols = []
    for (kh, kw) in ratios:
        oh = att_size - kh + 1
        ow = att_size - kw + 1
        for i in range(oh):
            for j in range(ow):
                m = np.zeros((att_size, att_size), np.float32)
                m[i:i + kh, j:j + kw] = 1.0 / (kh * kw)
                cols.append(m.reshape(-1))
    P = np.stack(cols, axis=1)                       # (64, 73)
    n_windows = P.shape[1]
    n_pad = ((n_windows + 127) // 128) * 128         # lane-dense output width
    P_pad = np.zeros((att_size * att_size, n_pad), np.float32)
    P_pad[:, :n_windows] = P
    return jnp.asarray(P_pad), n_windows


# ----------------------------------- APPM -----------------------------------

class APPM:
    """Holds the constant pooling weights; proposal selection is host-side NMS."""

    def __init__(self, att_size, ratios):
        self.pool_w, self.n_windows = build_pool_weight_matrix(att_size, ratios)

    def select_proposals(self, scores_np, proposalN, window_nums_sum,
                         N_list, iou_threshs):
        batch = scores_np.shape[0]
        proposalN_indices = []
        for i in range(batch):
            indices_results = []
            for j in range(len(window_nums_sum) - 1):
                lo = sum(window_nums_sum[:j + 1])
                hi = sum(window_nums_sum[:j + 2])
                indices_results.append(
                    nms(scores_np[i, lo:hi].reshape(-1, 1), proposalN=N_list[j],
                        iou_threshs=iou_threshs[j],
                        coordinates=coordinates_cat[lo:hi]) + lo)
            proposalN_indices.append(np.concatenate(indices_results, 1))
        proposalN_indices = np.array(proposalN_indices).reshape(batch, proposalN)
        # host-side gather of the selected window scores (73 floats; no extra
        # device dispatch / sync needed)
        proposalN_windows_scores = np.take_along_axis(
            scores_np, proposalN_indices, axis=1).astype(np.float32)
        return proposalN_indices.astype(np.int32), proposalN_windows_scores


# ---------------------------------- MainNet ----------------------------------

class MainNet:
    def __init__(self, proposalN, num_classes, channels=2048, seed=42):
        self.num_classes = num_classes
        self.proposalN = proposalN
        self.channels = channels
        self.ncls_pad = ((num_classes + 127) // 128) * 128   # lane-dense logits width
        key = jax.random.PRNGKey(seed)
        k1, k2, k3 = jax.random.split(key, 3)
        # TODO(synk): the full pretrained ResNet-50 backbone is not reproduced; a
        # deterministic linear stand-in (spatial-avg stem + 1x1 conv to `channels`
        # + global avg pool, all fused into the Pallas kernel) produces the
        # embedding with the same shape contract (channels == 2048).
        w_stem = jax.random.normal(k1, (3, channels), jnp.float32) * 0.05
        self.w_stem_pad = jnp.zeros((8, channels), jnp.float32).at[:3, :].set(w_stem)
        self.b_stem = (jax.random.normal(k2, (channels,), jnp.float32) * 0.01
                       ).reshape(1, channels)
        w_cls = jax.random.normal(k3, (channels, num_classes), jnp.float32) * 0.02
        # classifier weight: zero-pad to 128 lane-dense output and store bf16
        # (halves the dominant HBM read; MXU accumulates in f32)
        self.w_cls_bf16 = (jnp.zeros((channels, self.ncls_pad), jnp.float32)
                           .at[:, :num_classes].set(w_cls)).astype(jnp.bfloat16)
        self.b_cls_pad = jnp.zeros((1, self.ncls_pad), jnp.float32)
        self.APPM = APPM(ATT_SIZE, RATIOS)

    def forward(self, x, att, epoch, batch_idx, status='test'):
        assert self.channels == 2048
        batch_size = x.shape[0]
        coordinates = []
        # 1) one jitted device program: glue + single fused Pallas kernel
        logits, window_scores = _device_forward(
            x, att, self.w_stem_pad, self.b_stem, self.w_cls_bf16,
            self.b_cls_pad, self.APPM.pool_w,
            num_classes=self.num_classes, n_windows=self.APPM.n_windows)
        # 2) single blocking device->host sync; NMS + proposal-score gather on host
        scores_np = np.asarray(window_scores)                 # (B, n_windows)
        pidx_np, pscores_np = self.APPM.select_proposals(
            scores_np, self.proposalN, WINDOW_NUMS_SUM, N_LIST, IOU_THRESHS)
        proposalN_indices = jnp.asarray(pidx_np)
        proposalN_windows_scores = jnp.asarray(pscores_np)
        if status == 'train':
            # TODO(synk): train branch (bilinear crop+resize of proposal windows and
            # a second backbone pass) is not implemented; only the 'test' path runs.
            raise NotImplementedError("train branch not implemented in this synthetic kernel")
        else:
            proposalN_windows_logits = jnp.zeros(
                (batch_size * self.proposalN, self.num_classes), jnp.float32)
        return (proposalN_windows_scores, proposalN_windows_logits,
                proposalN_indices, window_scores, coordinates, logits)


# ----------------------------------- main -----------------------------------

if __name__ == "__main__":
    key = jax.random.PRNGKey(0)
    kx, ka = jax.random.split(key)
    x = jax.random.normal(kx, (2, 3, 32, 32), dtype=jnp.float32)
    att = jax.random.normal(ka, (2, 1, 8, 8), dtype=jnp.float32)

    model = MainNet(proposalN=PROPOSAL_N, num_classes=10, channels=2048)
    outs = model.forward(x, att, epoch=0, batch_idx=0, status='test')

    jax.block_until_ready([o for o in outs if isinstance(o, jax.Array)])
    print("KERNEL_OK")
</pallas_src>

<mosaic_0001>
module attributes {stable_mosaic.version = 11 : i64} {
  func.func @fused_forward_kernel(%arg0: i32, %arg1: memref<2x8xf32, #tpu.memory_space<vmem>>, %arg2: memref<8x2048xf32, #tpu.memory_space<vmem>>, %arg3: memref<1x2048xf32, #tpu.memory_space<vmem>>, %arg4: memref<1x128xf32, #tpu.memory_space<vmem>>, %arg5: memref<2x64xf32, #tpu.memory_space<vmem>>, %arg6: memref<64x128xf32, #tpu.memory_space<vmem>>, %arg7: memref<2048x128xbf16, #tpu.memory_space<any>>, %arg8: memref<2x128xf32, #tpu.memory_space<vmem>>, %arg9: memref<2x128xf32, #tpu.memory_space<vmem>>, %arg10: memref<2048x128xbf16, #tpu.memory_space<vmem>>, %arg11: memref<!tpu.dma_semaphore, #tpu.memory_space<semaphore_mem>>) attributes {dimension_semantics = [#tpu.dimension_semantics<arbitrary>], iteration_bounds = array<i64: 1>, scalar_prefetch = 0 : i64, scratch_operands = 2 : i64, tpu.core_type = #tpu.core_type<tc>, window_params = [{pipeline_mode = #tpu.pipeline_mode<synchronous>, transform_indices = @transform_0, window_bounds = array<i64: 2, 8>}, {pipeline_mode = #tpu.pipeline_mode<synchronous>, transform_indices = @transform_1, window_bounds = array<i64: 8, 2048>}, {pipeline_mode = #tpu.pipeline_mode<synchronous>, transform_indices = @transform_2, window_bounds = array<i64: 1, 2048>}, {pipeline_mode = #tpu.pipeline_mode<synchronous>, transform_indices = @transform_3, window_bounds = array<i64: 1, 128>}, {pipeline_mode = #tpu.pipeline_mode<synchronous>, transform_indices = @transform_4, window_bounds = array<i64: 2, 64>}, {pipeline_mode = #tpu.pipeline_mode<synchronous>, transform_indices = @transform_5, window_bounds = array<i64: 64, 128>}, {}, {pipeline_mode = #tpu.pipeline_mode<synchronous>, transform_indices = @transform_7, window_bounds = array<i64: 2, 128>}, {pipeline_mode = #tpu.pipeline_mode<synchronous>, transform_indices = @transform_8, window_bounds = array<i64: 2, 128>}]} {
    tpu.enqueue_dma source(%arg7 : memref<2048x128xbf16, #tpu.memory_space<any>>) target(%arg10 : memref<2048x128xbf16, #tpu.memory_space<vmem>>) target_semaphore(%arg11 : memref<!tpu.dma_semaphore, #tpu.memory_space<semaphore_mem>>)
    %c0 = arith.constant 0 : index
    %c0_0 = arith.constant 0 : index
    %0 = vector.load %arg5[%c0, %c0_0] : memref<2x64xf32, #tpu.memory_space<vmem>>, vector<2x64xf32>
    %c0_1 = arith.constant 0 : index
    %c0_2 = arith.constant 0 : index
    %1 = vector.load %arg6[%c0_1, %c0_2] : memref<64x128xf32, #tpu.memory_space<vmem>>, vector<64x128xf32>
    %cst = arith.constant dense<0.000000e+00> : vector<2x128xf32>
    %2 = tpu.matmul %0, %1, %cst {dimension_numbers = #tpu.dot_dimension_numbers<[1], [0], [0], [1], [0, 0, 1, 1], [], []>} : vector<2x64xf32>, vector<64x128xf32>, vector<2x128xf32> -> vector<2x128xf32>
    %c0_3 = arith.constant 0 : index
    %c0_4 = arith.constant 0 : index
    %3 = vector.load %arg9[%c0_3, %c0_4] : memref<2x128xf32, #tpu.memory_space<vmem>>, vector<2x128xf32>
    tpu.vector_store %arg9[%c0_3, %c0_4], %2 {strides = array<i32>} : memref<2x128xf32, #tpu.memory_space<vmem>>, vector<2x128xf32>,
    %c0_5 = arith.constant 0 : index
    %c0_6 = arith.constant 0 : index
    %4 = vector.load %arg1[%c0_5, %c0_6] : memref<2x8xf32, #tpu.memory_space<vmem>>, vector<2x8xf32>
    %c0_7 = arith.constant 0 : index
    %c0_8 = arith.constant 0 : index
    %5 = vector.load %arg2[%c0_7, %c0_8] : memref<8x2048xf32, #tpu.memory_space<vmem>>, vector<8x2048xf32>
    %cst_9 = arith.constant dense<0.000000e+00> : vector<2x2048xf32>
    %6 = tpu.matmul %4, %5, %cst_9 {dimension_numbers = #tpu.dot_dimension_numbers<[1], [0], [0], [1], [0, 0, 1, 1], [], []>} : vector<2x8xf32>, vector<8x2048xf32>, vector<2x2048xf32> -> vector<2x2048xf32>
    %c0_10 = arith.constant 0 : index
    %c0_11 = arith.constant 0 : index
    %7 = vector.load %arg3[%c0_10, %c0_11] : memref<1x2048xf32, #tpu.memory_space<vmem>>, vector<1x2048xf32>
    %8 = vector.broadcast %7 : vector<1x2048xf32> to vector<2x2048xf32>
    %9 = arith.addf %6, %8 : vector<2x2048xf32>
    tpu.wait_dma2 semaphore(%arg11 : memref<!tpu.dma_semaphore, #tpu.memory_space<semaphore_mem>>) src(%arg7 : memref<2048x128xbf16, #tpu.memory_space<any>>) dst(%arg10 : memref<2048x128xbf16, #tpu.memory_space<vmem>>)
    %10 = arith.truncf %9 : vector<2x2048xf32> to vector<2x2048xbf16>
    %c0_12 = arith.constant 0 : index
    %c0_13 = arith.constant 0 : index
    %11 = vector.load %arg10[%c0_12, %c0_13] : memref<2048x128xbf16, #tpu.memory_space<vmem>>, vector<2048x128xbf16>
    %cst_14 = arith.constant dense<0.000000e+00> : vector<2x128xf32>
    %12 = tpu.matmul %10, %11, %cst_14 {dimension_numbers = #tpu.dot_dimension_numbers<[1], [0], [0], [1], [0, 0, 1, 1], [], []>} : vector<2x2048xbf16>, vector<2048x128xbf16>, vector<2x128xf32> -> vector<2x128xf32>
    %c0_15 = arith.constant 0 : index
    %c0_16 = arith.constant 0 : index
    %13 = vector.load %arg4[%c0_15, %c0_16] : memref<1x128xf32, #tpu.memory_space<vmem>>, vector<1x128xf32>
    %14 = vector.broadcast %13 : vector<1x128xf32> to vector<2x128xf32>
    %15 = arith.addf %12, %14 : vector<2x128xf32>
    %c0_17 = arith.constant 0 : index
    %c0_18 = arith.constant 0 : index
    %16 = vector.load %arg8[%c0_17, %c0_18] : memref<2x128xf32, #tpu.memory_space<vmem>>, vector<2x128xf32>
    tpu.vector_store %arg8[%c0_17, %c0_18], %15 {strides = array<i32>} : memref<2x128xf32, #tpu.memory_space<vmem>>, vector<2x128xf32>,
    return
  }
  func.func @transform_0(%arg0: i32) -> (i32, i32) {
    %c0_i32 = arith.constant 0 : i32
    %c0_i32_0 = arith.constant 0 : i32
    %c0_i32_1 = arith.constant 0 : i32
    return %c0_i32, %c0_i32_0 : i32, i32
  }
  func.func @transform_1(%arg0: i32) -> (i32, i32) {
    %c0_i32 = arith.constant 0 : i32
    %c0_i32_0 = arith.constant 0 : i32
    %c0_i32_1 = arith.constant 0 : i32
    return %c0_i32, %c0_i32_0 : i32, i32
  }
  func.func @transform_2(%arg0: i32) -> (i32, i32) {
    %c0_i32 = arith.constant 0 : i32
    %c0_i32_0 = arith.constant 0 : i32
    %c0_i32_1 = arith.constant 0 : i32
    return %c0_i32, %c0_i32_0 : i32, i32
  }
  func.func @transform_3(%arg0: i32) -> (i32, i32) {
    %c0_i32 = arith.constant 0 : i32
    %c0_i32_0 = arith.constant 0 : i32
    %c0_i32_1 = arith.constant 0 : i32
    return %c0_i32, %c0_i32_0 : i32, i32
  }
  func.func @transform_4(%arg0: i32) -> (i32, i32) {
    %c0_i32 = arith.constant 0 : i32
    %c0_i32_0 = arith.constant 0 : i32
    %c0_i32_1 = arith.constant 0 : i32
    return %c0_i32, %c0_i32_0 : i32, i32
  }
  func.func @transform_5(%arg0: i32) -> (i32, i32) {
    %c0_i32 = arith.constant 0 : i32
    %c0_i32_0 = arith.constant 0 : i32
    %c0_i32_1 = arith.constant 0 : i32
    return %c0_i32, %c0_i32_0 : i32, i32
  }
  func.func @transform_7(%arg0: i32) -> (i32, i32) {
    %c0_i32 = arith.constant 0 : i32
    %c0_i32_0 = arith.constant 0 : i32
    %c0_i32_1 = arith.constant 0 : i32
    return %c0_i32, %c0_i32_0 : i32, i32
  }
  func.func @transform_8(%arg0: i32) -> (i32, i32) {
    %c0_i32 = arith.constant 0 : i32
    %c0_i32_0 = arith.constant 0 : i32
    %c0_i32_1 = arith.constant 0 : i32
    return %c0_i32, %c0_i32_0 : i32, i32
  }
}

</mosaic_0001>

<bundles_post_ra>
// kernel: _device_forward.1
= control target key start
LH: loop header
LB: loop body
LE: loop exit
PB: predicated region body
PF: predicated region fallthrough
CT: control target
= control target key end

     0   :  { %14 = vsyncpa [#allocation5], 0  ;;  %vm225_vm0 = vcmask 64512   ;;  %v1612_v3 = vmov 0.0|0.0   ;;  %v1613_v8 = vmov 0.0   ;;  %vm1614_vm1 = vmmov 0   ;;  %s1860_s0 = inlined_call_operand.vmem [shape: f32[2,8], index: 0, kind: input, shape index: {}]   ;;  %s1861_s1 = inlined_call_operand.vmem [shape: f32[8,2048], index: 1, kind: input, shape index: {}]   ;;  %s1862_s2 = inlined_call_operand.vmem [shape: f32[1,2048], index: 2, kind: input, shape index: {}]   ;;  %s1863_s3 = inlined_call_operand.vmem [shape: f32[1,128], index: 3, kind: input, shape index: {}]   ;;  %s1864_s4 = inlined_call_operand.vmem [shape: f32[2,64], index: 4, kind: input, shape index: {}]   ;;  %s1865_s5 = inlined_call_operand.vmem [shape: f32[64,128], index: 5, kind: input, shape index: {}]   ;;  %s1866_s6 = inlined_call_operand.hbm [shape: bf16[2048,128], index: 6, kind: input, shape index: {}]   ;;  %s1867_s7 = inlined_call_operand.hbm [shape: f32[2,128], index: 7, kind: output, shape index: {0}]   ;;  %s1868_s8 = inlined_call_operand.hbm [shape: f32[2,128], index: 8, kind: output, shape index: {1}]  }
   0x1   :  { %v41_v0 = vld [vmem:[%s1865_s5] sm:$0xff]  ;;  %v42_v1 = vld [vmem:[%s1865_s5 + $0x8] sm:$0xff]  ;;  %1522 = vmatprep.subr.bf16.mxu0 %v1612_v3  ;;  %v128_v7 = vld [vmem:[%s1861_s1 + $0x18] sm:$0xff]  ;;  %293 = vmatprep.mubr.f32.mxu1 %v1613_v8 }
   0x2   :  { %v126_v2 = vld [vmem:[%s1861_s1 + $0x8] sm:$0xff]  ;;  %v1523_v4 = vpack.c.bf16 %v42_v1, %v41_v0  ;;  %v125_v5 = vld [vmem:[%s1861_s1] sm:$0xff]  ;;  %v43_v9 = vld [vmem:[%s1865_s5 + $0x10] sm:$0xff]  ;;  %1519 = vmatprep.mubr.msk.f32.mxu0 %vm1614_vm1, %v1613_v8 }
   0x3   :  { %229 = vmatprep.subr.mxu1 %v126_v2  ;;  %v1678_v6 = vld [vmem:[%s1860_s0] sm:$0x3]  ;;  %v44_v10 = vld [vmem:[%s1865_s5 + $0x18] sm:$0xff]  ;;  %v127_v11 = vld [vmem:[%s1861_s1 + $0x10] sm:$0xff] }
   0x4   :  { %230 = vmatpush1.msra.mxu1 %v125_v5  ;;  %1524 = vmatpush3.bf16.msra.mxu0 %v1523_v4  ;;  %v1526_v12 = vpack.c.bf16 %v44_v10, %v43_v9  ;;  %v130_v13 = vld [vmem:[%s1861_s1 + $0x28] sm:$0xff]  ;;  %v45_v14 = vld [vmem:[%s1865_s5 + $0x20] sm:$0xff]  ;;  %v132_v17 = vld [vmem:[%s1861_s1 + $0x38] sm:$0xff] }
   0x5   :  { %1308 = vmatmul.mubr.msk.f32.vlgmr.msra.gmra.mrb[0].mxu1 %vm225_vm0, %v1678_v6  ;;  %1525 = vmatprep.subr.bf16.mxu0 %v1612_v3  ;;  %v46_v15 = vld [vmem:[%s1865_s5 + $0x28] sm:$0xff]  ;;  %v129_v16 = vld [vmem:[%s1861_s1 + $0x20] sm:$0xff]  ;;  %v47_v19 = vld [vmem:[%s1865_s5 + $0x30] sm:$0xff] }
   0x6   :  { %300 = vmatprep.subr.mxu1 %v128_v7  ;;  %364 = vmatprep.mubr.f32.mxu1 %v1613_v8  ;;  %v1529_v18 = vpack.c.bf16 %v46_v15, %v45_v14  ;;  %v48_v20 = vld [vmem:[%s1865_s5 + $0x38] sm:$0xff]  ;;  %v131_v21 = vld [vmem:[%s1861_s1 + $0x30] sm:$0xff] }
   0x7   :  { %301 = vmatpush1.msra.mxu1 %v127_v11 }
   0x8   :  { %371 = vmatprep.subr.mxu1 %v130_v13  ;;  %1527 = vmatpush3.bf16.msra.mxu0 %v1526_v12 }
   0x9   :  { %1309 = vmatmul.mubr.msk.f32.vlgmr.msra.gmra.mrb[2].mxu1 %vm225_vm0, %v1678_v6  ;;  %1528 = vmatprep.subr.bf16.mxu0 %v1612_v3 }
   0xa   :  { %372 = vmatpush1.msra.mxu1 %v129_v16  ;;  %435 = vmatprep.mubr.f32.mxu1 %v1613_v8 }
   0xb   :  { %442 = vmatprep.subr.mxu1 %v132_v17 }
   0xc   :  { %15 = vsyncpa [#allocation7], 0  ;;  %v134_v22 = vld [vmem:[%s1861_s1 + $0x48] sm:$0xff]  ;;  %1530 = vmatpush3.bf16.msra.mxu0 %v1529_v18  ;;  %v1532_v23 = vpack.c.bf16 %v48_v20, %v47_v19  ;;  %v136_v24 = vld [vmem:[%s1861_s1 + $0x58] sm:$0xff]  ;;  %vm49_vm2 = vcmask 523264   ;;  %s1615_s9 = smov [#allocation2]  }
   0xd   :  { %1310 = vmatmul.mubr.msk.f32.vlgmr.msra.gmra.mrb[4].mxu1 %vm225_vm0, %v1678_v6  ;;  %1531 = vmatprep.subr.bf16.mxu0 %v1612_v3  ;;  %v133_v25 = vld [vmem:[%s1861_s1 + $0x40] sm:$0xff]  ;;  %v138_v26 = vld [vmem:[%s1861_s1 + $0x68] sm:$0xff]  ;;  %v135_v28 = vld [vmem:[%s1861_s1 + $0x50] sm:$0xff]  ;;  %s36_s10 = sshll.u32 %s1615_s9, 4  ;;  %s37_s10 = int_to_ptr.vmem [resolvable:$true] %s36_s10 }
   0xe   :  { %443 = vmatpush1.msra.mxu1 %v131_v21  ;;  %506 = vmatprep.mubr.f32.mxu1 %v1613_v8  ;;  %v40_v27 = vld [vmem:[%s1864_s4] sm:$0x3]  ;;  %v140_v29 = vld [vmem:[%s1861_s1 + $0x78] sm:$0xff]  ;;  %v139_v31 = vld [vmem:[%s1861_s1 + $0x70] sm:$0xff] }
   0xf   :  { %513 = vmatprep.subr.mxu1 %v134_v22  ;;  %v137_v30 = vld [vmem:[%s1861_s1 + $0x60] sm:$0xff]  ;;  %s1540_s1 = scalar_lea.hbm %s1866_s6, 16384 }
  0x10   :  { %1533 = vmatpush3.bf16.msra.mxu0 %v1532_v23  ;;  %p1541_p0 = scmp.ne.s32.totalorder %s1866_s6, %s1540_s1  ;;  %p1544_p1 = scmp.lt.u32.totalorder %s1540_s1, %s1866_s6 }
  0x11   :  { %1311 = vmatmul.mubr.msk.f32.vlgmr.msra.gmra.mrb[6].mxu1 %vm225_vm0, %v1678_v6  ;;  %584 = vmatprep.subr.mxu0 %v136_v24 }
  0x12   :  { %514 = vmatpush1.msra.mxu1 %v133_v25  ;;  %577 = vmatprep.mubr.f32.mxu1 %v1613_v8  ;;  %p1546_p2 = pnand %p1544_p1, %p1541_p0 }
  0x13   :  { %655 = vmatprep.subr.mxu1 %v138_v26  ;;  %1520 = vmatmul.mubr.msk.f32.vlgmr.msra.gmra.mrb[0].mxu0 %vm49_vm2, %v40_v27 }
  0x14   :  { %585 = vmatpush1.msra.mxu0 %v135_v28  ;;  %648 = vmatprep.mubr.f32.mxu0 %v1613_v8 }
  0x15   :  { %1312 = vmatmul.mubr.msk.f32.vlgmr.msra.gmra.mrb[8].mxu1 %vm225_vm0, %v1678_v6  ;;  %726 = vmatprep.subr.mxu0 %v140_v29 }
  0x16   :  { %656 = vmatpush1.msra.mxu1 %v137_v30  ;;  %719 = vmatprep.mubr.f32.mxu1 %v1613_v8 }
  0x17   :  { %1313 = vmatmul.mubr.msk.f32.vlgmr.msra.gmra.mrb[2].mxu0 %vm225_vm0, %v1678_v6 }
  0x18   :  { %727 = vmatpush1.msra.mxu0 %v139_v31  ;;  %790 = vmatprep.mubr.f32.mxu0 %v1613_v8 }
  0x19   :  { %1314 = vmatmul.mubr.msk.f32.vlgmr.msra.gmra.mrb[10].mxu1 %vm225_vm0, %v1678_v6 }
  0x1b   :  { %1315 = vmatmul.mubr.msk.f32.vlgmr.msra.gmra.mrb[4].mxu0 %vm225_vm0, %v1678_v6 }
  0x1c   :  { %1549 = shalt.err (!%p1546_p2)  }
  0x1d   :  { %s1550_s17 = scalar_lea.vmem %s37_s10, 16384  ;;  %p1555_p4 = scmp.lt.s32.totalorder %s37_s10, %s37_s10 }
  0x1e   :  { %p1551_p3 = scmp.ne.s32.totalorder %s37_s10, %s1550_s17  ;;  %p1556_p5 = scmp.lt.s32.totalorder %s1550_s17, %s1550_s17 }
  0x20   :  { %p1557_p6 = por %p1556_p5, %p1555_p4 }
  0x22   :  { %p1558_p7 = pnand %p1557_p6, %p1551_p3 }
  0x24   :  { %1561 = shalt.err (!%p1558_p7)  }
  0x25   :  { %39 = dma.hbm_to_vmem [thread:$0]  %s1866_s6, 16384, %s37_s10, [#allocation3]  ;;  %v145_v32 = vlaneseq  ;;  %v141_v35 = vld [vmem:[%s1862_s2] sm:$0xff]  ;;  %v142_v63 = vld [vmem:[%s1862_s2 + $0x8] sm:$0xff] }
  0x27   :  { %v146_v33 = vshrl.u32 %v145_v32, 7 }
  0x29   :  { %v147_v34 = vsub.s32 0, %v146_v33  ;;  %v151_v36 = vsub.s32 1, %v146_v33  ;;  %v155_v38 = vsub.s32 2, %v146_v33  ;;  %v159_v40 = vsub.s32 3, %v146_v33 }
  0x2a   :  { %v163_v45 = vsub.s32 4, %v146_v33  ;;  %v167_v48 = vsub.s32 5, %v146_v33  ;;  %v171_v53 = vsub.s32 6, %v146_v33  ;;  %v175_v56 = vsub.s32 7, %v146_v33 }
  0x2b   :  { %v148_v37 = vrot.slane %v141_v35, %v147_v34  ;;  %v152_v39 = vrot.slane %v141_v35, %v151_v36  ;;  %v156_v44 = vrot.slane %v141_v35, %v155_v38  ;;  %v160_v47 = vrot.slane %v141_v35, %v159_v40 }
  0x2c   :  { %v164_v52 = vrot.slane %v141_v35, %v163_v45  ;;  %v168_v55 = vrot.slane %v141_v35, %v167_v48  ;;  %v172_v60 = vrot.slane %v141_v35, %v171_v53  ;;  %v176_v62 = vrot.slane %v141_v35, %v175_v56 }
  0x2d   :  { %v180_v4 = vrot.slane %v142_v63, %v147_v34  ;;  %v184_v6 = vrot.slane %v142_v63, %v151_v36  ;;  %v188_v8 = vrot.slane %v142_v63, %v155_v38  ;;  %v192_v10 = vrot.slane %v142_v63, %v159_v40 }
  0x2e   :  { %v196_v13 = vrot.slane %v142_v63, %v163_v45  ;;  %v200_v16 = vrot.slane %v142_v63, %v167_v48  ;;  %v204_v19 = vrot.slane %v142_v63, %v171_v53  ;;  %v208_v22 = vrot.slane %v142_v63, %v175_v56 }
  0xd8   :  { %v295_v41 = vpop.f32.mrb[0].mxu1 }
  0xd9   :  { %v1774_v42 = vadd.f32 %v295_v41, %v148_v37  ;;  %v297_v43 = vpop.f32.mrb[1].mxu1 }
  0xda   :  { %v298_v46 = vadd.f32 %v297_v43, %v152_v39 }
  0xdc   :  { %v366_v49 = vpop.f32.mrb[2].mxu1 }
  0xdd   :  { %v1776_v50 = vadd.f32 %v366_v49, %v156_v44  ;;  %v368_v51 = vpop.f32.mrb[3].mxu1 }
  0xde   :  { %v369_v54 = vadd.f32 %v368_v51, %v160_v47 }
  0xe0   :  { %v437_v57 = vpop.f32.mrb[4].mxu1 }
  0xe1   :  { %v1778_v58 = vadd.f32 %v437_v57, %v164_v52  ;;  %v439_v59 = vpop.f32.mrb[5].mxu1 }
  0xe2   :  { %v1780_v61 = vadd.f32 %v439_v59, %v168_v55 }
  0xe4   :  { %v508_v0 = vpop.f32.mrb[6].mxu1 }
  0xe5   :  { %v1785_v1 = vadd.f32 %v508_v0, %v172_v60  ;;  %v510_v2 = vpop.f32.mrb[7].mxu1 }
  0xe6   :  { %v1787_v3 = vadd.f32 %v510_v2, %v176_v62  ;;  %v119_v5 = vpop.f32.mrb[0].mxu0 }
  0xe7   :  { %123 = vst [vmem:[#allocation6] sm:$0x3] %v119_v5  ;;  %v1521_v7 = vpop.f32.mrb[1].mxu0 }
  0xe8   :  { %v579_v9 = vpop.f32.mrb[8].mxu1 }
  0xe9   :  { %v1789_v11 = vadd.f32 %v579_v9, %v180_v4  ;;  %v581_v12 = vpop.f32.mrb[9].mxu1 }
  0xea   :  { %v650_v14 = vpop.f32.mrb[2].mxu0  ;;  %v1791_v15 = vadd.f32 %v581_v12, %v184_v6 }
  0xeb   :  { %v1793_v17 = vadd.f32 %v650_v14, %v188_v8  ;;  %v652_v18 = vpop.f32.mrb[3].mxu0 }
  0xec   :  { %v1795_v20 = vadd.f32 %v652_v18, %v192_v10  ;;  %v721_v21 = vpop.f32.mrb[10].mxu1 }
  0xed   :  { %v1797_v23 = vadd.f32 %v721_v21, %v196_v13  ;;  %v723_v24 = vpop.f32.mrb[11].mxu1 }
  0xee   :  { %v792_v25 = vpop.f32.mrb[4].mxu0  ;;  %v1799_v26 = vadd.f32 %v723_v24, %v200_v16 }
  0xef   :  { %v1801_v27 = vadd.f32 %v792_v25, %v204_v19  ;;  %v794_v28 = vpop.f32.mrb[5].mxu0 }
  0xf0   :  { %v1803_v29 = vadd.f32 %v794_v28, %v208_v22 }
  0xf1   :  { %1606 = dma.done.wait [#allocation3], 16384 }
  0xf2   :  { %1607 = vsyncadd [#allocation3], 4294950912  ;;  %v802_v30 = vpack.c.bf16 %v298_v46, %v298_v46  ;;  %v804_v31 = vpack.c.bf16 %v369_v54, %v369_v54  ;;  %v825_v32 = vld [vmem:[#allocation2 + $0x40] sm:$0xff]  ;;  %v826_v36 = vld [vmem:[#allocation2 + $0x48] sm:$0xff]  ;;  %v801_v8 = vpack.c.bf16 %v1774_v42, %v1774_v42  ;;  %v803_v9 = vpack.c.bf16 %v1776_v50, %v1776_v50  ;;  %s1616_s2 = smov [#allocation6]  }
  0xf3   :  { %v841_v33 = vld [vmem:[#allocation2 + $0xc0] sm:$0xff]  ;;  %1327 = vmatprep.subr.bf16.mxu1 %v825_v32  ;;  %v842_v37 = vld [vmem:[#allocation2 + $0xc8] sm:$0xff]  ;;  %v827_v40 = vld [vmem:[#allocation2 + $0x50] sm:$0xff]  ;;  %v806_v16 = vpack.c.bf16 %v1780_v61, %v1780_v61  ;;  %v808_v18 = vpack.c.bf16 %v1787_v3, %v1787_v3  ;;  %s1289_s22 = sshll.u32 %s1616_s2, 4  ;;  %s1290_s22 = int_to_ptr.vmem [resolvable:$true] %s1289_s22 }
  0xf4   :  { %984 = vmatprep.mubr.bf16.mxu1 %v802_v30  ;;  %1024 = vmatprep.mubr.bf16.mxu0 %v804_v31  ;;  %v817_v34 = vld [vmem:[#allocation2] sm:$0xff]  ;;  %v818_v38 = vld [vmem:[#allocation2 + $0x8] sm:$0xff]  ;;  %v843_v41 = vld [vmem:[#allocation2 + $0xd0] sm:$0xff]  ;;  %s1562_s0 = scalar_lea.vmem %s1290_s22, 32  ;;  %p1567_p9 = scmp.lt.s32.totalorder %s1290_s22, %s1290_s22 }
  0xf5   :  { %1349 = vmatprep.subr.bf16.mxu0 %v841_v33  ;;  %v833_v35 = vld [vmem:[#allocation2 + $0x80] sm:$0xff]  ;;  %1328 = vmatpush3.bf16.msra.mxu1 %v817_v34  ;;  %v834_v39 = vld [vmem:[#allocation2 + $0x88] sm:$0xff]  ;;  %v819_v43 = vld [vmem:[#allocation2 + $0x10] sm:$0xff]  ;;  %p1563_p8 = scmp.ne.s32.totalorder %s1290_s22, %s1562_s0  ;;  %p1568_p10 = scmp.lt.s32.totalorder %s1562_s0, %s1562_s0 }
  0xf6   :  { %1350 = vmatpush3.bf16.msra.mxu0 %v833_v35  ;;  %1329 = vmatprep.subr.bf16.mxu1 %v826_v36  ;;  %v835_v44 = vld [vmem:[#allocation2 + $0x90] sm:$0xff]  ;;  %v828_v45 = vld [vmem:[#allocation2 + $0x58] sm:$0xff]  ;;  %v829_v49 = vld [vmem:[#allocation2 + $0x60] sm:$0xff] }
  0xf7   :  { %1351 = vmatprep.subr.bf16.mxu0 %v842_v37  ;;  %v844_v46 = vld [vmem:[#allocation2 + $0xd8] sm:$0xff]  ;;  %v845_v51 = vld [vmem:[#allocation2 + $0xe0] sm:$0xff]  ;;  %v830_v54 = vld [vmem:[#allocation2 + $0x68] sm:$0xff]  ;;  %p1569_p11 = por %p1568_p10, %p1567_p9 }
  0xf8   :  { %v820_v47 = vld [vmem:[#allocation2 + $0x18] sm:$0xff]  ;;  %v821_v52 = vld [vmem:[#allocation2 + $0x20] sm:$0xff]  ;;  %v846_v55 = vld [vmem:[#allocation2 + $0xe8] sm:$0xff] }
  0xf9   :  { %1330 = vmatpush3.bf16.msra.mxu1 %v818_v38  ;;  %v836_v48 = vld [vmem:[#allocation2 + $0x98] sm:$0xff]  ;;  %v837_v53 = vld [vmem:[#allocation2 + $0xa0] sm:$0xff]  ;;  %v822_v56 = vld [vmem:[#allocation2 + $0x28] sm:$0xff]  ;;  %p1570_p12 = pnand %p1569_p11, %p1563_p8 }
  0xfa   :  { %1352 = vmatpush3.bf16.msra.mxu0 %v834_v39  ;;  %1331 = vmatprep.subr.bf16.mxu1 %v827_v40  ;;  %v838_v57 = vld [vmem:[#allocation2 + $0xa8] sm:$0xff]  ;;  %v831_v59 = vld [vmem:[#allocation2 + $0x70] sm:$0xff]  ;;  %v832_v0 = vld [vmem:[#allocation2 + $0x78] sm:$0xff] }
  0xfb   :  { %1353 = vmatprep.subr.bf16.mxu0 %v843_v41  ;;  %v847_v60 = vld [vmem:[#allocation2 + $0xf0] sm:$0xff]  ;;  %v848_v2 = vld [vmem:[#allocation2 + $0xf8] sm:$0xff]  ;;  %v857_v6 = vld [vmem:[#allocation2 + $0x140] sm:$0xff] }
  0xfc   :  { %v823_v62 = vld [vmem:[#allocation2 + $0x30] sm:$0xff]  ;;  %v824_v4 = vld [vmem:[#allocation2 + $0x38] sm:$0xff]  ;;  %v873_v7 = vld [vmem:[#allocation2 + $0x1c0] sm:$0xff] }
  0xfd   :  { %1332 = vmatpush3.bf16.msra.mxu1 %v819_v43  ;;  %v839_v63 = vld [vmem:[#allocation2 + $0xb0] sm:$0xff]  ;;  %v840_v5 = vld [vmem:[#allocation2 + $0xb8] sm:$0xff]  ;;  %v849_v10 = vld [vmem:[#allocation2 + $0x100] sm:$0xff] }
  0xfe   :  { %1354 = vmatpush3.bf16.msra.mxu0 %v835_v44  ;;  %1333 = vmatprep.subr.bf16.mxu1 %v828_v45  ;;  %v865_v12 = vld [vmem:[#allocation2 + $0x180] sm:$0xff]  ;;  %v858_v13 = vld [vmem:[#allocation2 + $0x148] sm:$0xff]  ;;  %v859_v19 = vld [vmem:[#allocation2 + $0x150] sm:$0xff] }
  0xff   :  { %1355 = vmatprep.subr.bf16.mxu0 %v844_v46  ;;  %v874_v14 = vld [vmem:[#allocation2 + $0x1c8] sm:$0xff]  ;;  %v875_v21 = vld [vmem:[#allocation2 + $0x1d0] sm:$0xff]  ;;  %v860_v24 = vld [vmem:[#allocation2 + $0x158] sm:$0xff] }
 0x100   :  { %v850_v42 = vld [vmem:[#allocation2 + $0x108] sm:$0xff]  ;;  %v851_v61 = vld [vmem:[#allocation2 + $0x110] sm:$0xff]  ;;  %v876_v3 = vld [vmem:[#allocation2 + $0x1d8] sm:$0xff] }
 0x101   :  { %1334 = vmatpush3.bf16.msra.mxu1 %v820_v47  ;;  %v866_v50 = vld [vmem:[#allocation2 + $0x188] sm:$0xff]  ;;  %v867_v22 = vld [vmem:[#allocation2 + $0x190] sm:$0xff]  ;;  %v852_v25 = vld [vmem:[#allocation2 + $0x118] sm:$0xff] }
 0x102   :  { %1356 = vmatpush3.bf16.msra.mxu0 %v836_v48  ;;  %1335 = vmatprep.subr.bf16.mxu1 %v829_v49  ;;  %v868_v28 = vld [vmem:[#allocation2 + $0x198] sm:$0xff]  ;;  %v861_v30 = vld [vmem:[#allocation2 + $0x160] sm:$0xff]  ;;  %v862_v34 = vld [vmem:[#allocation2 + $0x168] sm:$0xff]  ;;  %v805_v49 = vpack.c.bf16 %v1778_v58, %v1778_v58 }
 0x103   :  { %1357 = vmatprep.subr.bf16.mxu0 %v845_v51  ;;  %v877_v31 = vld [vmem:[#allocation2 + $0x1e0] sm:$0xff]  ;;  %v878_v35 = vld [vmem:[#allocation2 + $0x1e8] sm:$0xff]  ;;  %v863_v38 = vld [vmem:[#allocation2 + $0x170] sm:$0xff]  ;;  %v807_v51 = vpack.c.bf16 %v1785_v1, %v1785_v1 }
 0x104   :  { %v853_v32 = vld [vmem:[#allocation2 + $0x120] sm:$0xff]  ;;  %v854_v36 = vld [vmem:[#allocation2 + $0x128] sm:$0xff]  ;;  %v879_v39 = vld [vmem:[#allocation2 + $0x1f0] sm:$0xff] }
 0x105   :  { %1336 = vmatpush3.bf16.msra.mxu1 %v821_v52  ;;  %v869_v33 = vld [vmem:[#allocation2 + $0x1a0] sm:$0xff]  ;;  %v870_v37 = vld [vmem:[#allocation2 + $0x1a8] sm:$0xff]  ;;  %v855_v40 = vld [vmem:[#allocation2 + $0x130] sm:$0xff] }
 0x106   :  { %1358 = vmatpush3.bf16.msra.mxu0 %v837_v53  ;;  %1337 = vmatprep.subr.bf16.mxu1 %v830_v54  ;;  %v871_v41 = vld [vmem:[#allocation2 + $0x1b0] sm:$0xff]  ;;  %v864_v43 = vld [vmem:[#allocation2 + $0x178] sm:$0xff]  ;;  %v889_v47 = vld [vmem:[#allocation2 + $0x240] sm:$0xff] }
 0x107   :  { %1359 = vmatprep.subr.bf16.mxu0 %v846_v55  ;;  %v880_v44 = vld [vmem:[#allocation2 + $0x1f8] sm:$0xff]  ;;  %v905_v48 = vld [vmem:[#allocation2 + $0x2c0] sm:$0xff]  ;;  %v890_v54 = vld [vmem:[#allocation2 + $0x248] sm:$0xff] }
 0x108   :  { %v856_v45 = vld [vmem:[#allocation2 + $0x138] sm:$0xff]  ;;  %v881_v52 = vld [vmem:[#allocation2 + $0x200] sm:$0xff]  ;;  %v906_v55 = vld [vmem:[#allocation2 + $0x2c8] sm:$0xff] }
 0x109   :  { %1338 = vmatpush3.bf16.msra.mxu1 %v822_v56  ;;  %v872_v46 = vld [vmem:[#allocation2 + $0x1b8] sm:$0xff]  ;;  %v897_v53 = vld [vmem:[#allocation2 + $0x280] sm:$0xff]  ;;  %v810_v56 = vpack.c.bf16 %v1791_v15, %v1791_v15  ;;  %v882_v58 = vld [vmem:[#allocation2 + $0x208] sm:$0xff] }
 0x10a   :  { %1360 = vmatpush3.bf16.msra.mxu0 %v838_v57  ;;  %1339 = vmatprep.subr.bf16.mxu1 %v831_v59  ;;  %v812_v57 = vpack.c.bf16 %v1795_v20, %v1795_v20  ;;  %v898_v1 = vld [vmem:[#allocation2 + $0x288] sm:$0xff]  ;;  %v891_v59 = vld [vmem:[#allocation2 + $0x250] sm:$0xff]  ;;  %v908_v20 = vld [vmem:[#allocation2 + $0x2d8] sm:$0xff] }
 0x10b   :  { %1361 = vmatprep.subr.bf16.mxu0 %v847_v60  ;;  %v907_v60 = vld [vmem:[#allocation2 + $0x2d0] sm:$0xff] }
 0x10c   :  { %v883_v15 = vld [vmem:[#allocation2 + $0x210] sm:$0xff] }
 0x10d   :  { %1340 = vmatpush3.bf16.msra.mxu1 %v823_v62  ;;  %v899_v62 = vld [vmem:[#allocation2 + $0x290] sm:$0xff] }
 0x10e   :  { %1362 = vmatpush3.bf16.msra.mxu0 %v839_v63  ;;  %1341 = vmatprep.subr.bf16.mxu1 %v832_v0  ;;  %v892_v63 = vld [vmem:[#allocation2 + $0x258] sm:$0xff] }
 0x10f   :  { %1363 = vmatprep.subr.bf16.mxu0 %v848_v2  ;;  %v884_v0 = vld [vmem:[#allocation2 + $0x218] sm:$0xff] }
 0x110   :  { %v900_v2 = vld [vmem:[#allocation2 + $0x298] sm:$0xff] }
 0x111   :  { %1342 = vmatpush3.bf16.msra.mxu1 %v824_v4  ;;  %v893_v4 = vld [vmem:[#allocation2 + $0x260] sm:$0xff] }
 0x112   :  { %1364 = vmatpush3.bf16.msra.mxu0 %v840_v5  ;;  %1371 = vmatprep.subr.bf16.mxu1 %v857_v6  ;;  %v909_v5 = vld [vmem:[#allocation2 + $0x2e0] sm:$0xff] }
 0x113   :  { %1393 = vmatprep.subr.bf16.mxu0 %v873_v7  ;;  %v885_v6 = vld [vmem:[#allocation2 + $0x220] sm:$0xff] }
 0x114   :  { %985 = vmatmul.mubr.bf16.vlgmr.msra.gmra.mrb[12].mxu1 %v801_v8  ;;  %v901_v7 = vld [vmem:[#allocation2 + $0x2a0] sm:$0xff]  ;;  %v894_v8 = vld [vmem:[#allocation2 + $0x268] sm:$0xff] }
 0x115   :  { %1025 = vmatmul.mubr.bf16.vlgmr.msra.gmra.mrb[8].mxu0 %v803_v9  ;;  %1372 = vmatpush3.bf16.msra.mxu1 %v849_v10  ;;  %v910_v9 = vld [vmem:[#allocation2 + $0x2e8] sm:$0xff] }
 0x116   :  { %1394 = vmatpush3.bf16.msra.mxu0 %v865_v12  ;;  %1373 = vmatprep.subr.bf16.mxu1 %v858_v13  ;;  %v886_v10 = vld [vmem:[#allocation2 + $0x228] sm:$0xff]  ;;  %v895_v13 = vld [vmem:[#allocation2 + $0x270] sm:$0xff] }
 0x117   :  { %1395 = vmatprep.subr.bf16.mxu0 %v874_v14  ;;  %1064 = vmatprep.mubr.bf16.mxu1 %v806_v16  ;;  %v902_v12 = vld [vmem:[#allocation2 + $0x2a8] sm:$0xff]  ;;  %v911_v14 = vld [vmem:[#allocation2 + $0x2f0] sm:$0xff] }
 0x118   :  { %1104 = vmatprep.mubr.bf16.mxu0 %v808_v18  ;;  %v887_v16 = vld [vmem:[#allocation2 + $0x230] sm:$0xff] }
 0x119   :  { %1374 = vmatpush3.bf16.msra.mxu1 %v850_v42  ;;  %v903_v18 = vld [vmem:[#allocation2 + $0x2b0] sm:$0xff]  ;;  %v896_v42 = vld [vmem:[#allocation2 + $0x278] sm:$0xff] }
 0x11a   :  { %1396 = vmatpush3.bf16.msra.mxu0 %v866_v50  ;;  %1375 = vmatprep.subr.bf16.mxu1 %v859_v19  ;;  %v912_v50 = vld [vmem:[#allocation2 + $0x2f8] sm:$0xff] }
 0x11b   :  { %1397 = vmatprep.subr.bf16.mxu0 %v875_v21  ;;  %v888_v19 = vld [vmem:[#allocation2 + $0x238] sm:$0xff] }
 0x11c   :  { %v904_v21 = vld [vmem:[#allocation2 + $0x2b8] sm:$0xff] }
 0x11d   :  { %1376 = vmatpush3.bf16.msra.mxu1 %v851_v61  ;;  %v921_v61 = vld [vmem:[#allocation2 + $0x340] sm:$0xff] }
 0x11e   :  { %1398 = vmatpush3.bf16.msra.mxu0 %v867_v22  ;;  %1377 = vmatprep.subr.bf16.mxu1 %v860_v24  ;;  %v937_v22 = vld [vmem:[#allocation2 + $0x3c0] sm:$0xff]  ;;  %v809_v24 = vpack.c.bf16 %v1789_v11, %v1789_v11  ;;  %v914_v11 = vld [vmem:[#allocation2 + $0x308] sm:$0xff] }
 0x11f   :  { %1399 = vmatprep.subr.bf16.mxu0 %v876_v3  ;;  %v811_v3 = vpack.c.bf16 %v1793_v17, %v1793_v17  ;;  %v930_v17 = vld [vmem:[#allocation2 + $0x388] sm:$0xff] }
 0x121   :  { %1378 = vmatpush3.bf16.msra.mxu1 %v852_v25  ;;  %v913_v25 = vld [vmem:[#allocation2 + $0x300] sm:$0xff] }
 0x122   :  { %1400 = vmatpush3.bf16.msra.mxu0 %v868_v28  ;;  %1379 = vmatprep.subr.bf16.mxu1 %v861_v30  ;;  %v929_v28 = vld [vmem:[#allocation2 + $0x380] sm:$0xff]  ;;  %v922_v30 = vld [vmem:[#allocation2 + $0x348] sm:$0xff] }
 0x123   :  { %1401 = vmatprep.subr.bf16.mxu0 %v877_v31  ;;  %v938_v31 = vld [vmem:[#allocation2 + $0x3c8] sm:$0xff] }
 0x125   :  { %1380 = vmatpush3.bf16.msra.mxu1 %v853_v32  ;;  %v814_v32 = vpack.c.bf16 %v1799_v26, %v1799_v26  ;;  %v915_v26 = vld [vmem:[#allocation2 + $0x310] sm:$0xff] }
 0x126   :  { %1402 = vmatpush3.bf16.msra.mxu0 %v869_v33  ;;  %1381 = vmatprep.subr.bf16.mxu1 %v862_v34  ;;  %v816_v33 = vpack.c.bf16 %v1803_v29, %v1803_v29  ;;  %v923_v34 = vld [vmem:[#allocation2 + $0x350] sm:$0xff]  ;;  %v940_v29 = vld [vmem:[#allocation2 + $0x3d8] sm:$0xff] }
 0x127   :  { %1403 = vmatprep.subr.bf16.mxu0 %v878_v35  ;;  %v939_v35 = vld [vmem:[#allocation2 + $0x3d0] sm:$0xff] }
 0x129   :  { %1382 = vmatpush3.bf16.msra.mxu1 %v854_v36  ;;  %v931_v36 = vld [vmem:[#allocation2 + $0x390] sm:$0xff] }
 0x12a   :  { %1404 = vmatpush3.bf16.msra.mxu0 %v870_v37  ;;  %1383 = vmatprep.subr.bf16.mxu1 %v863_v38  ;;  %v924_v37 = vld [vmem:[#allocation2 + $0x358] sm:$0xff] }
 0x12b   :  { %1405 = vmatprep.subr.bf16.mxu0 %v879_v39  ;;  %v916_v38 = vld [vmem:[#allocation2 + $0x318] sm:$0xff] }
 0x12c   :  { %v932_v39 = vld [vmem:[#allocation2 + $0x398] sm:$0xff] }
 0x12d   :  { %1384 = vmatpush3.bf16.msra.mxu1 %v855_v40  ;;  %v925_v40 = vld [vmem:[#allocation2 + $0x360] sm:$0xff] }
 0x12e   :  { %1406 = vmatpush3.bf16.msra.mxu0 %v871_v41  ;;  %1385 = vmatprep.subr.bf16.mxu1 %v864_v43  ;;  %v941_v41 = vld [vmem:[#allocation2 + $0x3e0] sm:$0xff] }
 0x12f   :  { %1407 = vmatprep.subr.bf16.mxu0 %v880_v44  ;;  %v917_v43 = vld [vmem:[#allocation2 + $0x320] sm:$0xff] }
 0x130   :  { %v933_v44 = vld [vmem:[#allocation2 + $0x3a0] sm:$0xff] }
 0x131   :  { %1386 = vmatpush3.bf16.msra.mxu1 %v856_v45  ;;  %v926_v45 = vld [vmem:[#allocation2 + $0x368] sm:$0xff] }
 0x132   :  { %1408 = vmatpush3.bf16.msra.mxu0 %v872_v46  ;;  %1415 = vmatprep.subr.bf16.mxu1 %v889_v47  ;;  %v942_v46 = vld [vmem:[#allocation2 + $0x3e8] sm:$0xff] }
 0x133   :  { %1437 = vmatprep.subr.bf16.mxu0 %v905_v48  ;;  %v918_v47 = vld [vmem:[#allocation2 + $0x328] sm:$0xff] }
 0x134   :  { %1065 = vmatmul.mubr.bf16.vlgmr.msra.gmra.mrb[16].mxu1 %v805_v49  ;;  %v934_v48 = vld [vmem:[#allocation2 + $0x3a8] sm:$0xff]  ;;  %v927_v49 = vld [vmem:[#allocation2 + $0x370] sm:$0xff] }
 0x135   :  { %1105 = vmatmul.mubr.bf16.vlgmr.msra.gmra.mrb[12].mxu0 %v807_v51  ;;  %1416 = vmatpush3.bf16.msra.mxu1 %v881_v52  ;;  %v943_v51 = vld [vmem:[#allocation2 + $0x3f0] sm:$0xff] }
 0x136   :  { %1438 = vmatpush3.bf16.msra.mxu0 %v897_v53  ;;  %1417 = vmatprep.subr.bf16.mxu1 %v890_v54  ;;  %v919_v52 = vld [vmem:[#allocation2 + $0x330] sm:$0xff]  ;;  %v928_v54 = vld [vmem:[#allocation2 + $0x378] sm:$0xff] }
 0x137   :  { %1439 = vmatprep.subr.bf16.mxu0 %v906_v55  ;;  %1144 = vmatprep.mubr.bf16.mxu1 %v810_v56  ;;  %v935_v53 = vld [vmem:[#allocation2 + $0x3b0] sm:$0xff]  ;;  %v944_v55 = vld [vmem:[#allocation2 + $0x3f8] sm:$0xff] }
 0x138   :  { %1184 = vmatprep.mubr.bf16.mxu0 %v812_v57  ;;  %v920_v56 = vld [vmem:[#allocation2 + $0x338] sm:$0xff] }
 0x139   :  { %1418 = vmatpush3.bf16.msra.mxu1 %v882_v58  ;;  %v936_v57 = vld [vmem:[#allocation2 + $0x3b8] sm:$0xff]  ;;  %v813_v58 = vpack.c.bf16 %v1797_v23, %v1797_v23 }
 0x13a   :  { %1440 = vmatpush3.bf16.msra.mxu0 %v898_v1  ;;  %1419 = vmatprep.subr.bf16.mxu1 %v891_v59  ;;  %v815_v1 = vpack.c.bf16 %v1801_v27, %v1801_v27 }
 0x13b   :  { %1441 = vmatprep.subr.bf16.mxu0 %v907_v60 }
 0x13d   :  { %1420 = vmatpush3.bf16.msra.mxu1 %v883_v15 }
 0x13e   :  { %1442 = vmatpush3.bf16.msra.mxu0 %v899_v62  ;;  %1421 = vmatprep.subr.bf16.mxu1 %v892_v63 }
 0x13f   :  { %1443 = vmatprep.subr.bf16.mxu0 %v908_v20 }
 0x141   :  { %1422 = vmatpush3.bf16.msra.mxu1 %v884_v0 }
 0x142   :  { %1444 = vmatpush3.bf16.msra.mxu0 %v900_v2  ;;  %1423 = vmatprep.subr.bf16.mxu1 %v893_v4 }
 0x143   :  { %1445 = vmatprep.subr.bf16.mxu0 %v909_v5 }
 0x145   :  { %1424 = vmatpush3.bf16.msra.mxu1 %v885_v6 }
 0x146   :  { %1446 = vmatpush3.bf16.msra.mxu0 %v901_v7  ;;  %1425 = vmatprep.subr.bf16.mxu1 %v894_v8 }
 0x147   :  { %1447 = vmatprep.subr.bf16.mxu0 %v910_v9 }
 0x149   :  { %1426 = vmatpush3.bf16.msra.mxu1 %v886_v10 }
 0x14a   :  { %1448 = vmatpush3.bf16.msra.mxu0 %v902_v12  ;;  %1427 = vmatprep.subr.bf16.mxu1 %v895_v13 }
 0x14b   :  { %1449 = vmatprep.subr.bf16.mxu0 %v911_v14 }
 0x14d   :  { %1428 = vmatpush3.bf16.msra.mxu1 %v887_v16 }
 0x14e   :  { %1450 = vmatpush3.bf16.msra.mxu0 %v903_v18  ;;  %1429 = vmatprep.subr.bf16.mxu1 %v896_v42 }
 0x14f   :  { %1451 = vmatprep.subr.bf16.mxu0 %v912_v50 }
 0x151   :  { %1430 = vmatpush3.bf16.msra.mxu1 %v888_v19 }
 0x152   :  { %1452 = vmatpush3.bf16.msra.mxu0 %v904_v21  ;;  %1459 = vmatprep.subr.bf16.mxu1 %v921_v61 }
 0x153   :  { %1481 = vmatprep.subr.bf16.mxu0 %v937_v22 }
 0x154   :  { %1145 = vmatmul.mubr.bf16.vlgmr.msra.gmra.mrb[20].mxu1 %v809_v24 }
 0x155   :  { %1185 = vmatmul.mubr.bf16.vlgmr.msra.gmra.mrb[16].mxu0 %v811_v3  ;;  %1460 = vmatpush3.bf16.msra.mxu1 %v913_v25 }
 0x156   :  { %1482 = vmatpush3.bf16.msra.mxu0 %v929_v28  ;;  %1461 = vmatprep.subr.bf16.mxu1 %v922_v30 }
 0x157   :  { %1483 = vmatprep.subr.bf16.mxu0 %v938_v31  ;;  %1224 = vmatprep.mubr.bf16.mxu1 %v814_v32 }
 0x158   :  { %1264 = vmatprep.mubr.bf16.mxu0 %v816_v33 }
 0x159   :  { %1462 = vmatpush3.bf16.msra.mxu1 %v914_v11 }
 0x15a   :  { %1484 = vmatpush3.bf16.msra.mxu0 %v930_v17  ;;  %1463 = vmatprep.subr.bf16.mxu1 %v923_v34 }
 0x15b   :  { %1485 = vmatprep.subr.bf16.mxu0 %v939_v35 }
 0x15d   :  { %1464 = vmatpush3.bf16.msra.mxu1 %v915_v26 }
 0x15e   :  { %1486 = vmatpush3.bf16.msra.mxu0 %v931_v36  ;;  %1465 = vmatprep.subr.bf16.mxu1 %v924_v37 }
 0x15f   :  { %1487 = vmatprep.subr.bf16.mxu0 %v940_v29 }
 0x161   :  { %1466 = vmatpush3.bf16.msra.mxu1 %v916_v38 }
 0x162   :  { %1488 = vmatpush3.bf16.msra.mxu0 %v932_v39  ;;  %1467 = vmatprep.subr.bf16.mxu1 %v925_v40 }
 0x163   :  { %1489 = vmatprep.subr.bf16.mxu0 %v941_v41 }
 0x165   :  { %1468 = vmatpush3.bf16.msra.mxu1 %v917_v43 }
 0x166   :  { %1490 = vmatpush3.bf16.msra.mxu0 %v933_v44  ;;  %1469 = vmatprep.subr.bf16.mxu1 %v926_v45 }
 0x167   :  { %1491 = vmatprep.subr.bf16.mxu0 %v942_v46 }
 0x169   :  { %1470 = vmatpush3.bf16.msra.mxu1 %v918_v47 }
 0x16a   :  { %1492 = vmatpush3.bf16.msra.mxu0 %v934_v48  ;;  %1471 = vmatprep.subr.bf16.mxu1 %v927_v49 }
 0x16b   :  { %1493 = vmatprep.subr.bf16.mxu0 %v943_v51 }
 0x16d   :  { %1472 = vmatpush3.bf16.msra.mxu1 %v919_v52 }
 0x16e   :  { %1494 = vmatpush3.bf16.msra.mxu0 %v935_v53  ;;  %1473 = vmatprep.subr.bf16.mxu1 %v928_v54 }
 0x16f   :  { %1495 = vmatprep.subr.bf16.mxu0 %v944_v55 }
 0x171   :  { %1474 = vmatpush3.bf16.msra.mxu1 %v920_v56 }
 0x172   :  { %1496 = vmatpush3.bf16.msra.mxu0 %v936_v57 }
 0x174   :  { %1225 = vmatmul.mubr.bf16.vlgmr.msra.gmra.mrb[24].mxu1 %v813_v58 }
 0x175   :  { %1265 = vmatmul.mubr.bf16.vlgmr.msra.gmra.mrb[20].mxu0 %v815_v1 }
 0x176   :  { %1573 = shalt.err (!%p1570_p12)
}
 0x177   :  { %s1574_s25 = scalar_lea.hbm %s1868_s8, 32 }
 0x178   :  { %p1575_p13 = scmp.ne.s32.totalorder %s1868_s8, %s1574_s25  ;;  %p1578_p0 = scmp.lt.u32.totalorder %s1574_s25, %s1868_s8 }
 0x17a   :  { %p1580_p1 = pnand %p1578_p0, %p1575_p13 }
 0x17c   :  { %1583 = shalt.err (!%p1580_p1)
}
 0x17d   :  { %1292 = dma.vmem_to_hbm [thread:$0]  %s1290_s22, 32, %s1868_s8, [#allocation7]   ;;  %v1316_v59 = vld [vmem:[%s1863_s3] ss:$0 sm:$0xff] }
 0x17e   :  { %s1617_s3 = smov [#allocation4]  }
 0x17f   :  { %s1279_s8 = sshll.u32 %s1617_s3, 4  ;;  %s1280_s8 = int_to_ptr.vmem [resolvable:$true] %s1279_s8 }
 0x180   :  { %s1584_s11 = scalar_lea.vmem %s1280_s8, 32  ;;  %p1589_p3 = scmp.lt.s32.totalorder %s1280_s8, %s1280_s8 }
 0x181   :  { %p1585_p2 = scmp.ne.s32.totalorder %s1280_s8, %s1584_s11  ;;  %p1590_p4 = scmp.lt.s32.totalorder %s1584_s11, %s1584_s11 }
 0x183   :  { %p1591_p5 = por %p1590_p4, %p1589_p3 }
 0x185   :  { %p1592_p6 = pnand %p1591_p5, %p1585_p2 }
 0x1e7   :  { %v1343_v23 = vpop.f32.mrb[12].mxu1 }
 0x1e8   :  { %v1365_v27 = vpop.f32.mrb[8].mxu0  ;;  %v1344_v60 = vpop.f32.mrb[13].mxu1 }
 0x1e9   :  { %v1366_v15 = vpop.f32.mrb[9].mxu0  ;;  %v1345_v62 = vadd.f32 %v1344_v60, %v1343_v23  ;;  %v1346_v20 = vpop.f32.mrb[14].mxu1 }
 0x1ea   :  { %v1367_v63 = vadd.f32 %v1366_v15, %v1365_v27  ;;  %v1368_v0 = vpop.f32.mrb[10].mxu0  ;;  %v1347_v2 = vpop.f32.mrb[15].mxu1 }
 0x1eb   :  { %v1369_v4 = vpop.f32.mrb[11].mxu0  ;;  %v987_v5 = vadd.f32 %v1345_v62, %v1316_v59 }
 0x1ed   :  { %v1027_v6 = vadd.f32 %v1367_v63, %v987_v5 }
 0x207   :  { %v1387_v7 = vpop.f32.mrb[16].mxu1 }
 0x208   :  { %v1409_v8 = vpop.f32.mrb[12].mxu0  ;;  %v1388_v9 = vpop.f32.mrb[17].mxu1 }
 0x209   :  { %v1410_v10 = vpop.f32.mrb[13].mxu0  ;;  %v1389_v12 = vadd.f32 %v1388_v9, %v1387_v7  ;;  %v1390_v14 = vpop.f32.mrb[18].mxu1 }
 0x20a   :  { %v1411_v13 = vadd.f32 %v1410_v10, %v1409_v8  ;;  %v1412_v16 = vpop.f32.mrb[14].mxu0  ;;  %v1391_v18 = vpop.f32.mrb[19].mxu1 }
 0x20b   :  { %v1413_v42 = vpop.f32.mrb[15].mxu0  ;;  %v1067_v50 = vadd.f32 %v1389_v12, %v1027_v6 }
 0x20d   :  { %v1107_v19 = vadd.f32 %v1411_v13, %v1067_v50 }
 0x227   :  { %v1431_v21 = vpop.f32.mrb[20].mxu1 }
 0x228   :  { %v1453_v61 = vpop.f32.mrb[16].mxu0  ;;  %v1432_v22 = vpop.f32.mrb[21].mxu1 }
 0x229   :  { %v1454_v24 = vpop.f32.mrb[17].mxu0  ;;  %v1433_v3 = vadd.f32 %v1432_v22, %v1431_v21  ;;  %v1434_v28 = vpop.f32.mrb[22].mxu1 }
 0x22a   :  { %v1455_v25 = vadd.f32 %v1454_v24, %v1453_v61  ;;  %v1456_v30 = vpop.f32.mrb[18].mxu0  ;;  %v1435_v31 = vpop.f32.mrb[23].mxu1 }
 0x22b   :  { %v1457_v32 = vpop.f32.mrb[19].mxu0  ;;  %v1147_v33 = vadd.f32 %v1433_v3, %v1107_v19 }
 0x22d   :  { %v1187_v11 = vadd.f32 %v1455_v25, %v1147_v33 }
 0x247   :  { %v1475_v17 = vpop.f32.mrb[24].mxu1 }
 0x248   :  { %v1497_v34 = vpop.f32.mrb[20].mxu0  ;;  %v1476_v35 = vpop.f32.mrb[25].mxu1 }
 0x249   :  { %v1498_v26 = vpop.f32.mrb[21].mxu0  ;;  %v1477_v36 = vadd.f32 %v1476_v35, %v1475_v17  ;;  %v1478_v29 = vpop.f32.mrb[26].mxu1 }
 0x24a   :  { %v1499_v37 = vadd.f32 %v1498_v26, %v1497_v34  ;;  %v1500_v38 = vpop.f32.mrb[22].mxu0  ;;  %v1479_v39 = vpop.f32.mrb[27].mxu1 }
 0x24b   :  { %v1501_v40 = vpop.f32.mrb[23].mxu0  ;;  %v1227_v41 = vadd.f32 %v1477_v36, %v1187_v11 }
 0x24d   :  { %v1267_v43 = vadd.f32 %v1499_v37, %v1227_v41 }
 0x24f   :  { %1272 = vst [vmem:[#allocation4] sm:$0x3] %v1267_v43 }
 0x250   :  { %1595 = shalt.err (!%p1592_p6)
}
 0x251   :  { %s1596_s13 = scalar_lea.hbm %s1867_s7, 32 }
 0x252   :  { %p1597_p7 = scmp.ne.s32.totalorder %s1867_s7, %s1596_s13  ;;  %p1600_p8 = scmp.lt.u32.totalorder %s1596_s13, %s1867_s7 }
 0x254   :  { %p1602_p9 = pnand %p1600_p8, %p1597_p7 }
 0x256   :  { %1605 = shalt.err (!%p1602_p9)
}
 0x257   :  { %1282 = dma.vmem_to_hbm [thread:$0]  %s1280_s8, 32, %s1867_s7, [#allocation5]  }
 0x258   :  { %1608 = dma.done.wait [#allocation5], 32  }
 0x259   :  { %1609 = vsyncadd [#allocation5], 4294967264 }
 0x25a   :  { %1610 = dma.done.wait [#allocation7], 32  }
 0x25b   :  { %1611 = vsyncadd [#allocation7], 4294967264 }
 0x25c   :  { %1299 = vsyncpa [#allocation5], 1 }
 0x25d   :  { %1300 = vsyncpa [#allocation7], 1 }
 0x25e   :  { %1301 = vsyncmov [#allocation3] }
 0x261   :  { %s1302_s19 = vpop.sfrf %1301 }
 0x262   :  { %p1317_p10 = scmp.ne.s32.totalorder %s1302_s19, 0 }
 0x264   :  { %1306 = shalt.err (%p1317_p10)  }

</bundles_post_ra>
